<compile_context>
chip_gen: v7x
topology: tpu7x:2x2x1
jax: 0.10.0
libtpu: 0.0.40
codegen_flags: <defaults>
</compile_context>

<pallas_src>
import numpy as np
import jax
import jax.numpy as jnp
from jax.experimental import pallas as pl
from jax.experimental.pallas import tpu as pltpu


def _round_up(x, m):
    return ((x + m - 1) // m) * m


def _mse_sum_kernel(t_ref, mu_ref, sc_ref, ep_ref, out_ref, acc_ref):
    k = pl.program_id(1)

    @pl.when(k == 0)
    def _():
        acc_ref[...] = jnp.zeros_like(acc_ref)

    # Load in source dtype, upcast to f32 for the accumulation.
    t = t_ref[...].astype(jnp.float32)
    mu = mu_ref[...].astype(jnp.float32)
    sc = sc_ref[...].astype(jnp.float32)
    ep = ep_ref[...].astype(jnp.float32)

    diff = t - (mu + sc * ep)
    d2 = diff * diff                      # (tb, td)
    tb, td = d2.shape
    # Fold rows into groups of 8 sublanes and add the groups together:
    # pure VALU vreg adds, no cross-lane (XLU) traffic in the hot loop.
    acc_ref[...] += jnp.sum(d2.reshape(tb // 8, 8, td), axis=0)

    @pl.when(k == pl.num_programs(1) - 1)
    def _():
        out_ref[...] = acc_ref[...]


def mse_loss_pallas(targets, loc, scale, eps, data_shape):
    """targets/loc/scale/eps: (B, C, H, W). Returns scalar loss (f32)."""
    B = loc.shape[0]
    D = int(np.prod(loc.shape[1:]))

    # targets.reshape(distribution.batch_shape) then flatten(start_dim=1).
    t2 = targets.reshape(B, D)
    mu2 = loc.reshape(B, D)
    sc2 = scale.reshape(B, D)
    ep2 = eps.reshape(B, D)

    # Tile sizes: TB multiple of 8 (<=128), TD multiple of 128 (<=2048).
    B_pad = _round_up(B, 8)
    D_pad = _round_up(D, 128)
    tb = next(t for t in (128, 64, 32, 16, 8) if B_pad % t == 0)
    td = next(t for t in (2048, 1024, 512, 256, 128) if D_pad % t == 0)

    if (B_pad, D_pad) != (B, D):
        pad = ((0, B_pad - B), (0, D_pad - D))
        t2, mu2, sc2, ep2 = [jnp.pad(a, pad) for a in (t2, mu2, sc2, ep2)]

    nb = B_pad // tb
    nk = D_pad // td

    in_spec = pl.BlockSpec((tb, td), lambda i, k: (i, k))
    out_spec = pl.BlockSpec((8, td), lambda i, k: (i, 0))

    in_bytes = sum(int(np.prod(a.shape)) * a.dtype.itemsize
                   for a in (t2, mu2, sc2, ep2))
    cost = pl.CostEstimate(
        flops=5 * B_pad * D_pad,
        transcendentals=0,
        bytes_accessed=in_bytes + nb * 8 * td * 4,
    )

    partials = pl.pallas_call(
        _mse_sum_kernel,
        out_shape=jax.ShapeDtypeStruct((nb * 8, td), jnp.float32),
        grid_spec=pltpu.PrefetchScalarGridSpec(
            num_scalar_prefetch=0,
            grid=(nb, nk),
            in_specs=[in_spec, in_spec, in_spec, in_spec],
            out_specs=out_spec,
            scratch_shapes=[pltpu.VMEM((8, td), jnp.float32)],
        ),
        compiler_params=pltpu.CompilerParams(
            dimension_semantics=("parallel", "arbitrary"),
            vmem_limit_bytes=32 * 1024 * 1024,
        ),
        cost_estimate=cost,
    )(t2, mu2, sc2, ep2)

    total_sse = jnp.sum(partials)          # tiny (nb*8, td) array

    scalar = B * float(np.prod(data_shape))
    loss = -total_sse / (scalar * np.log(2.0))

    # sigma = distribution.stddev[0, 0, 0, 0]; var = sigma**2
    sigma = scale[0, 0, 0, 0].astype(jnp.float32)
    var = sigma * sigma
    loss = loss / (2.0 * var)
    return loss


def mse_loss_reference(targets, loc, scale, eps, data_shape):
    """Pure-JAX reference mirroring the PyTorch module."""
    B = loc.shape[0]
    sample = loc + scale * eps
    t = targets.reshape(loc.shape)
    mse = (t - sample) ** 2
    per_example = jnp.sum(mse.reshape(B, -1).astype(jnp.float32), axis=1)
    scalar = B * float(np.prod(data_shape))
    loss = -jnp.sum(per_example) / (scalar * np.log(2.0))
    sigma = scale[0, 0, 0, 0].astype(jnp.float32)
    return loss / (2.0 * sigma * sigma)


if __name__ == "__main__":
    B, C, H, W = 2, 4, 16, 16
    data_shape = (C, H, W)

    key = jax.random.PRNGKey(0)
    k_t, k_mu, k_eps = jax.random.split(key, 3)

    targets = jax.random.normal(k_t, (B, C, H, W), dtype=jnp.float32)
    loc = jax.random.normal(k_mu, (B, C, H, W), dtype=jnp.float32)
    # Deterministic positive stddev (constant, like a fixed-sigma decoder).
    scale = jnp.full((B, C, H, W), 0.5, dtype=jnp.float32)
    # Reparameterization noise for rsample() (sample = loc + scale*eps is
    # computed inside the kernel).
    eps = jax.random.normal(k_eps, (B, C, H, W), dtype=jnp.float32)

    loss = mse_loss_pallas(targets, loc, scale, eps, data_shape)
    loss = jax.block_until_ready(loss)

    ref = mse_loss_reference(targets, loc, scale, eps, data_shape)
    np.testing.assert_allclose(np.asarray(loss), np.asarray(ref),
                               rtol=1e-5, atol=1e-5)

    print("KERNEL_OK")
</pallas_src>

<mosaic_0001>
module attributes {stable_mosaic.version = 11 : i64} {
  func.func @_mse_sum_kernel(%arg0: i32, %arg1: i32, %arg2: memref<8x1024xf32, #tpu.memory_space<vmem>>, %arg3: memref<8x1024xf32, #tpu.memory_space<vmem>>, %arg4: memref<8x1024xf32, #tpu.memory_space<vmem>>, %arg5: memref<8x1024xf32, #tpu.memory_space<vmem>>, %arg6: memref<8x1024xf32, #tpu.memory_space<vmem>>, %arg7: memref<8x1024xf32, #tpu.memory_space<vmem>>) attributes {dimension_semantics = [#tpu.dimension_semantics<parallel>, #tpu.dimension_semantics<arbitrary>], iteration_bounds = array<i64: 1, 1>, scalar_prefetch = 0 : i64, scratch_operands = 1 : i64, tpu.core_type = #tpu.core_type<tc>, window_params = [{transform_indices = @transform_0, window_bounds = array<i64: 8, 1024>}, {transform_indices = @transform_1, window_bounds = array<i64: 8, 1024>}, {transform_indices = @transform_2, window_bounds = array<i64: 8, 1024>}, {transform_indices = @transform_3, window_bounds = array<i64: 8, 1024>}, {transform_indices = @transform_4, window_bounds = array<i64: 8, 1024>}]} {
    %c0_i32 = arith.constant 0 : i32
    %0 = arith.cmpi eq, %arg1, %c0_i32 : i32
    %1 = arith.extui %0 : i1 to i32
    %c0_i32_0 = arith.constant 0 : i32
    %2 = arith.cmpi ne, %1, %c0_i32_0 : i32
    scf.if %2 {
      %cst_14 = arith.constant 0.000000e+00 : f32
      %19 = vector.broadcast %cst_14 : f32 to vector<8x1024xf32>
      %c0_15 = arith.constant 0 : index
      %c0_16 = arith.constant 0 : index
      %20 = vector.load %arg7[%c0_15, %c0_16] : memref<8x1024xf32, #tpu.memory_space<vmem>>, vector<8x1024xf32>
      tpu.vector_store %arg7[%c0_15, %c0_16], %19 {strides = array<i32>} : memref<8x1024xf32, #tpu.memory_space<vmem>>, vector<8x1024xf32>,
    } else {
    }
    %c0 = arith.constant 0 : index
    %c0_1 = arith.constant 0 : index
    %3 = vector.load %arg2[%c0, %c0_1] : memref<8x1024xf32, #tpu.memory_space<vmem>>, vector<8x1024xf32>
    %c0_2 = arith.constant 0 : index
    %c0_3 = arith.constant 0 : index
    %4 = vector.load %arg3[%c0_2, %c0_3] : memref<8x1024xf32, #tpu.memory_space<vmem>>, vector<8x1024xf32>
    %c0_4 = arith.constant 0 : index
    %c0_5 = arith.constant 0 : index
    %5 = vector.load %arg4[%c0_4, %c0_5] : memref<8x1024xf32, #tpu.memory_space<vmem>>, vector<8x1024xf32>
    %c0_6 = arith.constant 0 : index
    %c0_7 = arith.constant 0 : index
    %6 = vector.load %arg5[%c0_6, %c0_7] : memref<8x1024xf32, #tpu.memory_space<vmem>>, vector<8x1024xf32>
    %7 = arith.mulf %5, %6 : vector<8x1024xf32>
    %8 = arith.addf %4, %7 : vector<8x1024xf32>
    %9 = arith.subf %3, %8 : vector<8x1024xf32>
    %10 = arith.mulf %9, %9 : vector<8x1024xf32>
    %c0_8 = arith.constant 0 : index
    %c0_9 = arith.constant 0 : index
    %11 = vector.load %arg7[%c0_8, %c0_9] : memref<8x1024xf32, #tpu.memory_space<vmem>>, vector<8x1024xf32>
    %12 = vector.shape_cast %10 : vector<8x1024xf32> to vector<1x8x1024xf32>
    %cst = arith.constant dense<0.000000e+00> : vector<8x1024xf32>
    %13 = vector.multi_reduction <add>, %12, %cst [0] : vector<1x8x1024xf32> to vector<8x1024xf32>
    %14 = arith.addf %11, %13 : vector<8x1024xf32>
    %c0_10 = arith.constant 0 : index
    %c0_11 = arith.constant 0 : index
    %15 = vector.load %arg7[%c0_10, %c0_11] : memref<8x1024xf32, #tpu.memory_space<vmem>>, vector<8x1024xf32>
    tpu.vector_store %arg7[%c0_10, %c0_11], %14 {strides = array<i32>} : memref<8x1024xf32, #tpu.memory_space<vmem>>, vector<8x1024xf32>,
    %c0_i32_12 = arith.constant 0 : i32
    %16 = arith.cmpi eq, %arg1, %c0_i32_12 : i32
    %17 = arith.extui %16 : i1 to i32
    %c0_i32_13 = arith.constant 0 : i32
    %18 = arith.cmpi ne, %17, %c0_i32_13 : i32
    scf.if %18 {
      %c0_14 = arith.constant 0 : index
      %c0_15 = arith.constant 0 : index
      %19 = vector.load %arg7[%c0_14, %c0_15] : memref<8x1024xf32, #tpu.memory_space<vmem>>, vector<8x1024xf32>
      %c0_16 = arith.constant 0 : index
      %c0_17 = arith.constant 0 : index
      %20 = vector.load %arg6[%c0_16, %c0_17] : memref<8x1024xf32, #tpu.memory_space<vmem>>, vector<8x1024xf32>
      tpu.vector_store %arg6[%c0_16, %c0_17], %19 {strides = array<i32>} : memref<8x1024xf32, #tpu.memory_space<vmem>>, vector<8x1024xf32>,
    } else {
    }
    return
  }
  func.func @transform_0(%arg0: i32, %arg1: i32) -> (i32, i32) {
    %c0_i32 = arith.constant 0 : i32
    return %arg0, %arg1 : i32, i32
  }
  func.func @transform_1(%arg0: i32, %arg1: i32) -> (i32, i32) {
    %c0_i32 = arith.constant 0 : i32
    return %arg0, %arg1 : i32, i32
  }
  func.func @transform_2(%arg0: i32, %arg1: i32) -> (i32, i32) {
    %c0_i32 = arith.constant 0 : i32
    return %arg0, %arg1 : i32, i32
  }
  func.func @transform_3(%arg0: i32, %arg1: i32) -> (i32, i32) {
    %c0_i32 = arith.constant 0 : i32
    return %arg0, %arg1 : i32, i32
  }
  func.func @transform_4(%arg0: i32, %arg1: i32) -> (i32, i32) {
    %c0_i32 = arith.constant 0 : i32
    %c0_i32_0 = arith.constant 0 : i32
    return %arg0, %c0_i32 : i32, i32
  }
}

</mosaic_0001>

<bundles_post_ra>
// kernel: tpu_custom_call.1
= control target key start
LH: loop header
LB: loop body
LE: loop exit
PB: predicated region body
PF: predicated region fallthrough
CT: control target
= control target key end

     0   :  { %9 = vsyncpa [#allocation4], 0  ;;  %s422_s0 = inlined_call_operand.hbm [shape: f32[8,1024], index: 0, kind: input, shape index: {}]   ;;  %s423_s1 = inlined_call_operand.hbm [shape: f32[8,1024], index: 1, kind: input, shape index: {}]   ;;  %s424_s2 = inlined_call_operand.hbm [shape: f32[8,1024], index: 2, kind: input, shape index: {}]   ;;  %s425_s3 = inlined_call_operand.hbm [shape: f32[8,1024], index: 3, kind: input, shape index: {}]   ;;  %s426_s4 = inlined_call_operand.hbm [shape: f32[8,1024], index: 4, kind: output, shape index: {}]  }
   0x1   :  { %10 = vsyncpa [#allocation7], 0 }
   0x2   :  { %11 = vsyncpa [#allocation10], 0 }
   0x3   :  { %12 = vsyncpa [#allocation5], 0  ;;  %s332_s15 = smov [#allocation6]   ;;  %s333_s17 = smov [#allocation3]  }
   0x4   :  { %s29_s16 = sshll.u32 %s332_s15, 4  ;;  %s19_s18 = sshll.u32 %s333_s17, 4  ;;  %s30_s16 = int_to_ptr.vmem [resolvable:$true] %s29_s16  ;;  %s20_s18 = int_to_ptr.vmem [resolvable:$true] %s19_s18 }
   0x5   :  { %s214_s21 = scalar_lea.hbm %s423_s1, 1024 }
   0x6   :  { %p215_p0 = scmp.ne.s32.totalorder %s423_s1, %s214_s21  ;;  %p218_p1 = scmp.lt.u32.totalorder %s214_s21, %s423_s1 }
   0x8   :  { %p220_p2 = pnand %p218_p1, %p215_p0 }
   0xa   :  { %223 = shalt.err (!%p220_p2)
}
   0xb   :  { %s224_s26 = scalar_lea.vmem %s30_s16, 1024  ;;  %p229_p4 = scmp.lt.s32.totalorder %s30_s16, %s30_s16 }
   0xc   :  { %p225_p3 = scmp.ne.s32.totalorder %s30_s16, %s224_s26  ;;  %p230_p5 = scmp.lt.s32.totalorder %s224_s26, %s224_s26 }
   0xe   :  { %p231_p6 = por %p230_p5, %p229_p4 }
  0x10   :  { %p232_p7 = pnand %p231_p6, %p225_p3 }
  0x12   :  { %235 = shalt.err (!%p232_p7)
}
  0x13   :  { %32 = dma.hbm_to_vmem [thread:$0]  %s423_s1, 1024, %s30_s16, [#allocation7]  }
  0x14   :  { %s236_s5 = scalar_lea.hbm %s422_s0, 1024 }
  0x15   :  { %p237_p8 = scmp.ne.s32.totalorder %s422_s0, %s236_s5  ;;  %p240_p9 = scmp.lt.u32.totalorder %s236_s5, %s422_s0 }
  0x17   :  { %p242_p10 = pnand %p240_p9, %p237_p8 }
  0x19   :  { %245 = shalt.err (!%p242_p10)
}
  0x1a   :  { %s246_s10 = scalar_lea.vmem %s20_s18, 1024  ;;  %p251_p12 = scmp.lt.s32.totalorder %s20_s18, %s20_s18 }
  0x1b   :  { %p247_p11 = scmp.ne.s32.totalorder %s20_s18, %s246_s10  ;;  %p252_p13 = scmp.lt.s32.totalorder %s246_s10, %s246_s10 }
  0x1d   :  { %p253_p0 = por %p252_p13, %p251_p12 }
  0x1f   :  { %p254_p1 = pnand %p253_p0, %p247_p11 }
  0x21   :  { %257 = shalt.err (!%p254_p1)
}
  0x22   :  { %22 = dma.hbm_to_vmem [thread:$0]  %s422_s0, 1024, %s20_s18, [#allocation4]  }
  0x23   :  { %s334_s12 = smov [#allocation8]   ;;  %s335_s14 = smov [#allocation9]  }
  0x24   :  { %s39_s13 = sshll.u32 %s334_s12, 4  ;;  %s49_s15 = sshll.u32 %s335_s14, 4  ;;  %s40_s13 = int_to_ptr.vmem [resolvable:$true] %s39_s13  ;;  %s50_s15 = int_to_ptr.vmem [resolvable:$true] %s49_s15 }
  0x25   :  { %s258_s19 = scalar_lea.hbm %s424_s2, 1024 }
  0x26   :  { %p259_p2 = scmp.ne.s32.totalorder %s424_s2, %s258_s19  ;;  %p262_p3 = scmp.lt.u32.totalorder %s258_s19, %s424_s2 }
  0x28   :  { %p264_p4 = pnand %p262_p3, %p259_p2 }
  0x2a   :  { %267 = shalt.err (!%p264_p4)
}
  0x2b   :  { %s268_s0 = scalar_lea.vmem %s40_s13, 1024  ;;  %p273_p6 = scmp.lt.s32.totalorder %s40_s13, %s40_s13 }
  0x2c   :  { %p269_p5 = scmp.ne.s32.totalorder %s40_s13, %s268_s0  ;;  %p274_p7 = scmp.lt.s32.totalorder %s268_s0, %s268_s0 }
  0x2e   :  { %p275_p8 = por %p274_p7, %p273_p6 }
  0x30   :  { %p276_p9 = pnand %p275_p8, %p269_p5 }
  0x32   :  { %279 = shalt.err (!%p276_p9)
}
  0x33   :  { %42 = dma.hbm_to_vmem [thread:$0]  %s424_s2, 1024, %s40_s13, [#allocation7]  }
  0x34   :  { %s280_s27 = scalar_lea.hbm %s425_s3, 1024 }
  0x35   :  { %p281_p10 = scmp.ne.s32.totalorder %s425_s3, %s280_s27  ;;  %p284_p11 = scmp.lt.u32.totalorder %s280_s27, %s425_s3 }
  0x37   :  { %p286_p12 = pnand %p284_p11, %p281_p10 }
  0x39   :  { %289 = shalt.err (!%p286_p12)
}
  0x3a   :  { %s290_s6 = scalar_lea.vmem %s50_s15, 1024  ;;  %p295_p0 = scmp.lt.s32.totalorder %s50_s15, %s50_s15 }
  0x3b   :  { %p291_p13 = scmp.ne.s32.totalorder %s50_s15, %s290_s6  ;;  %p296_p1 = scmp.lt.s32.totalorder %s290_s6, %s290_s6 }
  0x3d   :  { %p297_p2 = por %p296_p1, %p295_p0 }
  0x3f   :  { %p298_p3 = pnand %p297_p2, %p291_p13 }
  0x41   :  { %301 = shalt.err (!%p298_p3)
}
  0x42   :  { %52 = dma.hbm_to_vmem [thread:$0]  %s425_s3, 1024, %s50_s15, [#allocation10]  }
  0x43   :  { %324 = dma.done.wait [#allocation4], 1024  }
  0x44   :  { %325 = vsyncadd [#allocation4], 4294966272 }
  0x45   :  { %326 = dma.done.wait [#allocation7], 2048  }
  0x46   :  { %327 = vsyncadd [#allocation7], 4294965248 }
  0x47   :  { %328 = dma.done.wait [#allocation10], 1024  }
  0x48   :  { %329 = vsyncadd [#allocation10], 4294966272  ;;  %v93_v0 = vld [vmem:[#allocation8] sm:$0xff]  ;;  %v86_v5 = vld [vmem:[#allocation6 + $0x8] sm:$0xff]  ;;  %s336_s3 = smov [#allocation11]  }
  0x49   :  { %v77_v1 = vld [vmem:[#allocation3] sm:$0xff]  ;;  %v94_v6 = vld [vmem:[#allocation8 + $0x8] sm:$0xff]  ;;  %v87_v9 = vld [vmem:[#allocation6 + $0x10] sm:$0xff]  ;;  %s198_s8 = sshll.u32 %s336_s3, 4  ;;  %s199_s8 = int_to_ptr.vmem [resolvable:$true] %s198_s8 }
  0x4a   :  { %v85_v2 = vld [vmem:[#allocation6] sm:$0xff]  ;;  %v102_v7 = vld [vmem:[#allocation9 + $0x8] sm:$0xff]  ;;  %v95_v10 = vld [vmem:[#allocation8 + $0x10] sm:$0xff]  ;;  %s302_s9 = scalar_lea.vmem %s199_s8, 1024  ;;  %p307_p5 = scmp.lt.s32.totalorder %s199_s8, %s199_s8 }
  0x4b   :  { %v101_v3 = vld [vmem:[#allocation9] sm:$0xff]  ;;  %v110_v8 = vmul.f32 %v102_v7, %v94_v6  ;;  %v103_v11 = vld [vmem:[#allocation9 + $0x10] sm:$0xff]  ;;  %v78_v13 = vld [vmem:[#allocation3 + $0x8] sm:$0xff]  ;;  %p303_p4 = scmp.ne.s32.totalorder %s199_s8, %s302_s9  ;;  %p308_p6 = scmp.lt.s32.totalorder %s302_s9, %s302_s9 }
  0x4c   :  { %v109_v4 = vmul.f32 %v101_v3, %v93_v0  ;;  %v79_v14 = vld [vmem:[#allocation3 + $0x10] sm:$0xff]  ;;  %v111_v15 = vmul.f32 %v103_v11, %v95_v10  ;;  %v96_v16 = vld [vmem:[#allocation8 + $0x18] sm:$0xff]  ;;  %v89_v24 = vld [vmem:[#allocation6 + $0x20] sm:$0xff] }
  0x4d   :  { %v118_v17 = vadd.f32 %v110_v8, %v86_v5  ;;  %v80_v18 = vld [vmem:[#allocation3 + $0x18] sm:$0xff]  ;;  %v97_v25 = vld [vmem:[#allocation8 + $0x20] sm:$0xff]  ;;  %v90_v29 = vld [vmem:[#allocation6 + $0x28] sm:$0xff]  ;;  %p309_p7 = por %p308_p6, %p307_p5 }
  0x4e   :  { %v117_v12 = vadd.f32 %v109_v4, %v85_v2  ;;  %v88_v19 = vld [vmem:[#allocation6 + $0x18] sm:$0xff]  ;;  %v119_v22 = vadd.f32 %v111_v15, %v87_v9  ;;  %v105_v26 = vld [vmem:[#allocation9 + $0x20] sm:$0xff]  ;;  %v98_v30 = vld [vmem:[#allocation8 + $0x28] sm:$0xff] }
  0x4f   :  { %v104_v20 = vld [vmem:[#allocation9 + $0x18] sm:$0xff]  ;;  %v126_v27 = vsub.f32 %v78_v13, %v118_v17  ;;  %v113_v28 = vmul.f32 %v105_v26, %v97_v25  ;;  %v106_v31 = vld [vmem:[#allocation9 + $0x28] sm:$0xff]  ;;  %v81_v35 = vld [vmem:[#allocation3 + $0x20] sm:$0xff]  ;;  %p310_p8 = pnand %p309_p7, %p303_p4 }
  0x50   :  { %v125_v21 = vsub.f32 %v77_v1, %v117_v12  ;;  %v112_v23 = vmul.f32 %v104_v20, %v96_v16  ;;  %v127_v33 = vsub.f32 %v79_v14, %v119_v22  ;;  %v114_v36 = vmul.f32 %v106_v31, %v98_v30  ;;  %v99_v37 = vld [vmem:[#allocation8 + $0x30] sm:$0xff]  ;;  %v82_v40 = vld [vmem:[#allocation3 + $0x28] sm:$0xff]  ;;  %v92_v47 = vld [vmem:[#allocation6 + $0x38] sm:$0xff] }
  0x51   :  { %v134_v38 = vmul.f32 %v126_v27, %v126_v27  ;;  %v121_v39 = vadd.f32 %v113_v28, %v89_v24  ;;  %v91_v41 = vld [vmem:[#allocation6 + $0x30] sm:$0xff]  ;;  %v100_v48 = vld [vmem:[#allocation8 + $0x38] sm:$0xff] }
  0x52   :  { %v133_v32 = vmul.f32 %v125_v21, %v125_v21  ;;  %v120_v34 = vadd.f32 %v112_v23, %v88_v19  ;;  %v107_v42 = vld [vmem:[#allocation9 + $0x30] sm:$0xff]  ;;  %v135_v43 = vmul.f32 %v127_v33, %v127_v33  ;;  %v122_v45 = vadd.f32 %v114_v36, %v90_v29  ;;  %v108_v49 = vld [vmem:[#allocation9 + $0x38] sm:$0xff] }
  0x53   :  { %v115_v46 = vmul.f32 %v107_v42, %v99_v37  ;;  %185 = vst [vmem:[#allocation11 + $0x8] sm:$0xff] %v134_v38  ;;  %v129_v50 = vsub.f32 %v81_v35, %v121_v39  ;;  %v83_v51 = vld [vmem:[#allocation3 + $0x30] sm:$0xff]  ;;  %v116_v52 = vmul.f32 %v108_v49, %v100_v48  ;;  %v84_v56 = vld [vmem:[#allocation3 + $0x38] sm:$0xff] }
  0x54   :  { %184 = vst [vmem:[#allocation11] sm:$0xff] %v133_v32  ;;  %v128_v44 = vsub.f32 %v80_v18, %v120_v34  ;;  %186 = vst [vmem:[#allocation11 + $0x10] sm:$0xff] %v135_v43  ;;  %v130_v54 = vsub.f32 %v82_v40, %v122_v45 }
  0x55   :  { %v123_v55 = vadd.f32 %v115_v46, %v91_v41  ;;  %v137_v57 = vmul.f32 %v129_v50, %v129_v50  ;;  %v124_v58 = vadd.f32 %v116_v52, %v92_v47 }
  0x56   :  { %v136_v53 = vmul.f32 %v128_v44, %v128_v44  ;;  %v138_v59 = vmul.f32 %v130_v54, %v130_v54 }
  0x57   :  { %v131_v60 = vsub.f32 %v83_v51, %v123_v55  ;;  %188 = vst [vmem:[#allocation11 + $0x20] sm:$0xff] %v137_v57  ;;  %v132_v61 = vsub.f32 %v84_v56, %v124_v58 }
  0x58   :  { %187 = vst [vmem:[#allocation11 + $0x18] sm:$0xff] %v136_v53  ;;  %189 = vst [vmem:[#allocation11 + $0x28] sm:$0xff] %v138_v59 }
  0x59   :  { %v139_v62 = vmul.f32 %v131_v60, %v131_v60  ;;  %v140_v63 = vmul.f32 %v132_v61, %v132_v61 }
  0x5b   :  { %190 = vst [vmem:[#allocation11 + $0x30] sm:$0xff] %v139_v62  ;;  %191 = vst [vmem:[#allocation11 + $0x38] sm:$0xff] %v140_v63 }
  0x5c   :  { %313 = shalt.err (!%p310_p8)
}
  0x5d   :  { %s314_s11 = scalar_lea.hbm %s426_s4, 1024 }
  0x5e   :  { %p315_p9 = scmp.ne.s32.totalorder %s426_s4, %s314_s11  ;;  %p318_p10 = scmp.lt.u32.totalorder %s314_s11, %s426_s4 }
  0x60   :  { %p320_p11 = pnand %p318_p10, %p315_p9 }
  0x62   :  { %323 = shalt.err (!%p320_p11)
}
  0x63   :  { %201 = dma.vmem_to_hbm [thread:$0]  %s199_s8, 1024, %s426_s4, [#allocation5]  }
  0x64   :  { %330 = dma.done.wait [#allocation5], 1024  }
  0x65   :  { %331 = vsyncadd [#allocation5], 4294966272 }
  0x66   :  { %205 = vsyncpa [#allocation4], 1 }
  0x67   :  { %206 = vsyncpa [#allocation7], 1 }
  0x68   :  { %207 = vsyncpa [#allocation10], 1 }
  0x69   :  { %208 = vsyncpa [#allocation5], 1 }

</bundles_post_ra>
